<compile_context>
chip_gen: v6e
topology: v6e:2x2x1
jax: 0.10.0
libtpu: 0.0.40
codegen_flags: <defaults>
</compile_context>

<pallas_src>
import functools
import math

import jax
import jax.numpy as jnp
from jax.experimental import pallas as pl
from jax.experimental.pallas import tpu as pltpu

_S0 = math.sqrt(2.0) * math.log(2.0)      # initial self.s
_EPS2 = 1e-24                             # F.normalize eps (1e-12), squared for rsqrt
_CLAMP = 1e-7                             # clamp for acos


def _cdiv(a, b):
    return -(-a // b)


def _round_up(n, m):
    return ((n + m - 1) // m) * m


def _vmem_capacity_bytes():
    try:
        cap = getattr(pltpu.get_tpu_info(), "vmem_capacity_bytes", None)
        if cap:
            return int(cap)
    except Exception:
        pass
    return 64 * 1024 * 1024               # conservative (v7x-sized) fallback


# --------------------------- shared cosine tile ---------------------------
def _normalized_cosine(x_ref, w_ref):
    """cos(x_i, w_j) for the current (tile_b, F) x (tile_c, F) tiles, f32 on the MXU."""
    x = x_ref[...].astype(jnp.float32)
    w = w_ref[...].astype(jnp.float32)
    # F.normalize: v / max(||v||, eps)  ==  v * rsqrt(max(||v||^2, eps^2))
    inv_x = jax.lax.rsqrt(jnp.maximum(jnp.sum(x * x, axis=1, keepdims=True), _EPS2))
    inv_w = jax.lax.rsqrt(jnp.maximum(jnp.sum(w * w, axis=1, keepdims=True), _EPS2))
    # Contract the last dim of both operands: W is fed as (C, F), no transpose needed.
    # (bf16 casting of the operands here would ~2x MXU throughput on v6e/v7x; opt-in only.)
    return jax.lax.dot_general(
        x * inv_x, w * inv_w,
        dimension_numbers=(((1,), (1,)), ((), ())),
        preferred_element_type=jnp.float32)


# --------------------------- kernel bodies ---------------------------
def _logits_only_kernel(x_ref, w_ref, logits_ref):
    logits_ref[...] = _normalized_cosine(x_ref, w_ref)


def _logits_stats_kernel(x_ref, w_ref, lbl_ref, logits_ref, bsum_ref, tgt_ref,
                         *, num_classes, tile_c, nc_inner, need_mask):
    p = pl.program_id(1)
    j = pl.program_id(2)

    logits = _normalized_cosine(x_ref, w_ref)
    logits_ref[...] = logits               # OOB columns of a ragged last tile are clipped

    @pl.when(j == 0)
    def _():
        bsum_ref[...] = jnp.zeros_like(bsum_ref)
        tgt_ref[...] = jnp.zeros_like(tgt_ref)

    # class ids of this (unclamped) grid step; on ragged / chunk-overflow steps they run past
    # num_classes and the mask below zeroes their contribution (no double counting).
    class_ids = (p * nc_inner + j) * tile_c + jax.lax.broadcasted_iota(
        jnp.int32, logits.shape, 1)
    is_target = class_ids == lbl_ref[...]                   # (tile_b, tile_c)
    keep = jnp.logical_not(is_target)
    if need_mask:                                           # static: only when tiles can be ragged/dup
        keep = jnp.logical_and(keep, class_ids < num_classes)
    # B_avg numerator: exp(s0 * cos) over valid non-target classes
    bsum_ref[...] += jnp.sum(jnp.where(keep, jnp.exp(_S0 * logits), 0.0),
                             axis=1, keepdims=True)
    # target-class cosine per row (theta / median handled in the glue)
    tgt_ref[...] += jnp.sum(jnp.where(is_target, logits, 0.0), axis=1, keepdims=True)


def _scale_ce_kernel(logits_ref, s_ref, out_ref, expsum_ref,
                     *, num_classes, tile_c, nc_inner, need_mask):
    p = pl.program_id(1)
    j = pl.program_id(2)

    s = s_ref[0, 0]
    out = s * logits_ref[...]
    out_ref[...] = out                                      # aliased in-place over logits

    @pl.when(j == 0)
    def _():
        expsum_ref[...] = jnp.zeros_like(expsum_ref)

    # cos in [-1, 1(+fp eps)] => out - s <= ~0 : fixed logsumexp stabilizer m = s
    e = jnp.exp(out - s)
    if need_mask:
        class_ids = (p * nc_inner + j) * tile_c + jax.lax.broadcasted_iota(
            jnp.int32, out.shape, 1)
        e = jnp.where(class_ids < num_classes, e, 0.0)
    expsum_ref[...] += jnp.sum(e, axis=1, keepdims=True)


# --------------------------------- wrapper ---------------------------------
def adacos_forward(x, W, label=None):
    """Mirrors AdaCos.forward: returns logits if label is None, else (loss, output)."""
    B, F = x.shape
    C, Fw = W.shape
    assert F == Fw

    itemsize = 4                                            # tiles are consumed in f32
    vmem_cap = _vmem_capacity_bytes()
    small_vmem = vmem_cap <= 64 * 1024 * 1024               # v7x-class chips
    vmem_limit = min(vmem_cap * 3 // 5, 64 * 1024 * 1024)
    w_budget = (6 if small_vmem else 8) * 1024 * 1024       # per W-tile buffer
    x_budget = 4 * 1024 * 1024                              # per x-tile buffer

    # ---- batch tiling: rows up to 256, padded to a multiple of 8 ----
    tb_cap = max(8, (x_budget // (F * itemsize)) // 8 * 8)
    max_tb = min(256, tb_cap)
    nb = _cdiv(B, max_tb)
    tile_b = _round_up(_cdiv(B, nb), 8)
    b_pad = _round_up(B, tile_b)
    nb = b_pad // tile_b

    # ---- class tiling: lane-dense 512-wide tiles, or one full-width block if C fits ----
    tc_cap = max(128, (w_budget // (F * itemsize)) // 128 * 128)
    max_tc = min(512, tc_cap)
    tile_c = C if C <= max_tc else max_tc
    nc = _cdiv(C, tile_c)

    x_p = jnp.pad(x, ((0, b_pad - B), (0, 0))) if b_pad != B else x

    if label is None:
        # slim inference path: in-kernel normalization + matmul only
        logits = pl.pallas_call(
            _logits_only_kernel,
            grid=(nb, nc),
            in_specs=[pl.BlockSpec((tile_b, F), lambda i, j: (i, 0)),
                      pl.BlockSpec((tile_c, F), lambda i, j: (j, 0))],
            out_specs=pl.BlockSpec((tile_b, tile_c), lambda i, j: (i, j)),
            out_shape=jax.ShapeDtypeStruct((b_pad, C), jnp.float32),
            compiler_params=pltpu.CompilerParams(
                dimension_semantics=("parallel", "parallel"),
                vmem_limit_bytes=vmem_limit),
        )(x_p, W)
        return logits[:B, :]

    # Give the second TensorCore work when there is only one B tile (v7x megacore): split the
    # class blocks into two "parallel" chunks; per-chunk bsum/tgt partials are summed in glue.
    n_par = 2 if (nb == 1 and nc >= 2) else 1
    nc_inner = _cdiv(nc, n_par)
    dup_possible = n_par * nc_inner > nc                    # chunk-overflow steps exist
    need_mask1 = (C % tile_c != 0) or dup_possible
    last_c_block = nc - 1

    def c_block(p, j):                                      # clamp overflow steps to last block
        return jnp.minimum(p * nc_inner + j, last_c_block)

    lbl = label.reshape(B, 1).astype(jnp.int32)
    if b_pad != B:
        lbl = jnp.pad(lbl, ((0, b_pad - B), (0, 0)))

    kernel1 = functools.partial(_logits_stats_kernel, num_classes=C, tile_c=tile_c,
                                nc_inner=nc_inner, need_mask=need_mask1)

    logits, part_bsum, part_tgt = pl.pallas_call(
        kernel1,
        grid=(nb, n_par, nc_inner),
        in_specs=[
            pl.BlockSpec((tile_b, F), lambda i, p, j: (i, 0)),
            pl.BlockSpec((tile_c, F), lambda i, p, j: (c_block(p, j), 0)),
            pl.BlockSpec((tile_b, 1), lambda i, p, j: (i, 0)),
        ],
        out_specs=(
            pl.BlockSpec((tile_b, tile_c), lambda i, p, j: (i, c_block(p, j))),
            pl.BlockSpec((None, tile_b, 1), lambda i, p, j: (p, i, 0)),
            pl.BlockSpec((None, tile_b, 1), lambda i, p, j: (p, i, 0)),
        ),
        out_shape=(
            jax.ShapeDtypeStruct((b_pad, C), jnp.float32),
            jax.ShapeDtypeStruct((n_par, b_pad, 1), jnp.float32),
            jax.ShapeDtypeStruct((n_par, b_pad, 1), jnp.float32),
        ),
        compiler_params=pltpu.CompilerParams(
            dimension_semantics=("parallel", "parallel", "arbitrary"),
            vmem_limit_bytes=vmem_limit),
    )(x_p, W, lbl)

    # ---- adaptive scale update (B scalars, plain-JAX glue; mirrors torch.no_grad block) ----
    tgt = jnp.sum(part_tgt, axis=0)[:B, 0]                  # per-row target cosine
    b_avg = jnp.sum(jnp.sum(part_bsum, axis=0)[:B, 0]) / jnp.float32(B)
    theta = jnp.arccos(jnp.clip(tgt, -1.0 + _CLAMP, 1.0 - _CLAMP))
    theta_med = jnp.sort(theta)[(B - 1) // 2]               # torch.median: lower median
    s_new = jnp.log(b_avg) / jnp.cos(jnp.minimum(jnp.float32(math.pi / 4.0), theta_med))
    # TODO(synk): PyTorch keeps self.s as module state across calls; here B_avg always uses the
    # initial s0 and s is recomputed per call (faithful for a fresh module / single forward).

    # ---- scale + CE statistics: pure streaming pass over logits, larger blocks ----
    tile_b2 = b_pad if b_pad <= 256 else 256
    max_tc2 = max(512, ((512 * 1024) // tile_b2) // 128 * 128)     # ~2 MiB f32 per buffer
    tile_c2 = C if C <= max_tc2 else max_tc2
    nb2 = _cdiv(b_pad, tile_b2)
    nc2 = _cdiv(C, tile_c2)
    # aliased output forbids duplicate block visits -> only split the class chunks exactly
    n_par2 = 2 if (nb2 == 1 and nc2 >= 2 and nc2 % 2 == 0) else 1
    nc2_inner = nc2 // n_par2
    need_mask2 = (C % tile_c2 != 0)

    kernel2 = functools.partial(_scale_ce_kernel, num_classes=C, tile_c=tile_c2,
                                nc_inner=nc2_inner, need_mask=need_mask2)

    out_p, part_expsum = pl.pallas_call(
        kernel2,
        grid=(nb2, n_par2, nc2_inner),
        in_specs=[
            pl.BlockSpec((tile_b2, tile_c2), lambda i, p, j: (i, p * nc2_inner + j)),
            pl.BlockSpec(memory_space=pltpu.MemorySpace.SMEM),
        ],
        out_specs=(
            pl.BlockSpec((tile_b2, tile_c2), lambda i, p, j: (i, p * nc2_inner + j)),
            pl.BlockSpec((None, tile_b2, 1), lambda i, p, j: (p, i, 0)),
        ),
        out_shape=(
            jax.ShapeDtypeStruct((b_pad, C), jnp.float32),
            jax.ShapeDtypeStruct((n_par2, b_pad, 1), jnp.float32),
        ),
        input_output_aliases={0: 0},                        # out = s*logits written in place
        compiler_params=pltpu.CompilerParams(
            dimension_semantics=("parallel", "parallel", "arbitrary"),
            vmem_limit_bytes=vmem_limit),
    )(logits, s_new.reshape(1, 1).astype(jnp.float32))

    # CrossEntropyLoss (mean): mean_b [ (s + log sum_c exp(out_bc - s)) - s*cos_target_b ]
    expsum = jnp.sum(part_expsum, axis=0)[:B, 0]
    loss = jnp.mean((s_new + jnp.log(expsum)) - s_new * tgt)
    return loss, out_p[:B, :]


# --------------------------------- reference & test ---------------------------------
def _xavier_uniform(key, shape):
    fan_out, fan_in = shape                                 # xavier_uniform_ on (C, F)
    bound = math.sqrt(6.0 / (fan_in + fan_out))
    return jax.random.uniform(key, shape, jnp.float32, -bound, bound)


def _adacos_reference(x, W, label=None):
    """Pure-JAX mirror of the PyTorch module, for validation."""
    xn = x / jnp.maximum(jnp.linalg.norm(x, axis=1, keepdims=True), 1e-12)
    wn = W / jnp.maximum(jnp.linalg.norm(W, axis=1, keepdims=True), 1e-12)
    logits = xn @ wn.T
    if label is None:
        return logits
    n = x.shape[0]
    theta = jnp.arccos(jnp.clip(logits, -1.0 + _CLAMP, 1.0 - _CLAMP))
    one_hot = jax.nn.one_hot(label, W.shape[0], dtype=logits.dtype)
    b_avg = jnp.sum(jnp.where(one_hot < 1, jnp.exp(_S0 * logits), 0.0)) / n
    theta_med = jnp.sort(theta[jnp.arange(n), label])[(n - 1) // 2]
    s = jnp.log(b_avg) / jnp.cos(jnp.minimum(jnp.float32(math.pi / 4.0), theta_med))
    output = s * logits
    lse = jax.scipy.special.logsumexp(output, axis=1)
    loss = jnp.mean(lse - output[jnp.arange(n), label])
    return loss, output


if __name__ == "__main__":
    def _check_case(B, F, C):
        key = jax.random.PRNGKey(0)
        kx, kw, kl = jax.random.split(key, 3)
        x = jax.random.normal(kx, (B, F), dtype=jnp.float32)
        W = _xavier_uniform(kw, (C, F))
        label = jax.random.randint(kl, (B,), 0, C, dtype=jnp.int32)

        loss, output = adacos_forward(x, W, label)
        jax.block_until_ready((loss, output))
        assert output.shape == (B, C)
        assert bool(jnp.isfinite(loss))
        ref_loss, ref_out = _adacos_reference(x, W, label)
        assert bool(jnp.allclose(loss, ref_loss, rtol=2e-3, atol=2e-3))
        assert bool(jnp.allclose(output, ref_out, rtol=2e-3, atol=2e-3))

        logits_only = adacos_forward(x, W)                  # label=None inference path
        jax.block_until_ready(logits_only)
        assert logits_only.shape == (B, C)
        assert bool(jnp.allclose(logits_only, _adacos_reference(x, W), rtol=2e-3, atol=2e-3))

    _check_case(B=8, F=64, C=16)      # single class tile, no masking
    _check_case(B=8, F=64, C=1200)    # multiple class tiles: ragged edge + 2-chunk class split
    print("KERNEL_OK")
</pallas_src>

<mosaic_0001>
module attributes {stable_mosaic.version = 11 : i64} {
  func.func @_logits_stats_kernel(%arg0: i32, %arg1: i32, %arg2: i32, %arg3: memref<8x64xf32, #tpu.memory_space<vmem>>, %arg4: memref<16x64xf32, #tpu.memory_space<vmem>>, %arg5: memref<8x1xi32, #tpu.memory_space<vmem>>, %arg6: memref<8x16xf32, #tpu.memory_space<vmem>>, %arg7: memref<1x8x1xf32, #tpu.memory_space<vmem>>, %arg8: memref<1x8x1xf32, #tpu.memory_space<vmem>>) attributes {dimension_semantics = [#tpu.dimension_semantics<parallel>, #tpu.dimension_semantics<parallel>, #tpu.dimension_semantics<arbitrary>], iteration_bounds = array<i64: 1, 1, 1>, scalar_prefetch = 0 : i64, scratch_operands = 0 : i64, tpu.core_type = #tpu.core_type<tc>, window_params = [{transform_indices = @transform_0, window_bounds = array<i64: 8, 64>}, {transform_indices = @transform_1, window_bounds = array<i64: 16, 64>}, {transform_indices = @transform_2, window_bounds = array<i64: 8, 1>}, {transform_indices = @transform_3, window_bounds = array<i64: 8, 16>}, {transform_indices = @transform_4, window_bounds = array<i64: 1, 8, 1>}, {transform_indices = @transform_5, window_bounds = array<i64: 1, 8, 1>}]} {
    %c0 = arith.constant 0 : index
    %c0_0 = arith.constant 0 : index
    %0 = vector.load %arg3[%c0, %c0_0] : memref<8x64xf32, #tpu.memory_space<vmem>>, vector<8x64xf32>
    %c0_1 = arith.constant 0 : index
    %c0_2 = arith.constant 0 : index
    %1 = vector.load %arg4[%c0_1, %c0_2] : memref<16x64xf32, #tpu.memory_space<vmem>>, vector<16x64xf32>
    %2 = arith.mulf %0, %0 : vector<8x64xf32>
    %cst = arith.constant dense<0.000000e+00> : vector<8xf32>
    %3 = vector.multi_reduction <add>, %2, %cst [1] : vector<8x64xf32> to vector<8xf32>
    %4 = vector.shape_cast %3 : vector<8xf32> to vector<8x1xf32>
    %cst_3 = arith.constant 1.000000e-24 : f32
    %5 = vector.broadcast %cst_3 : f32 to vector<8x1xf32>
    %6 = arith.maximumf %4, %5 : vector<8x1xf32>
    %7 = math.rsqrt %6 : vector<8x1xf32>
    %8 = arith.mulf %1, %1 : vector<16x64xf32>
    %cst_4 = arith.constant dense<0.000000e+00> : vector<16xf32>
    %9 = vector.multi_reduction <add>, %8, %cst_4 [1] : vector<16x64xf32> to vector<16xf32>
    %10 = vector.shape_cast %9 : vector<16xf32> to vector<16x1xf32>
    %cst_5 = arith.constant 1.000000e-24 : f32
    %11 = vector.broadcast %cst_5 : f32 to vector<16x1xf32>
    %12 = arith.maximumf %10, %11 : vector<16x1xf32>
    %13 = math.rsqrt %12 : vector<16x1xf32>
    %14 = vector.broadcast %7 : vector<8x1xf32> to vector<8x64xf32>
    %15 = arith.mulf %0, %14 : vector<8x64xf32>
    %16 = vector.broadcast %13 : vector<16x1xf32> to vector<16x64xf32>
    %17 = arith.mulf %1, %16 : vector<16x64xf32>
    %cst_6 = arith.constant dense<0.000000e+00> : vector<8x16xf32>
    %18 = tpu.matmul %15, %17, %cst_6 {dimension_numbers = #tpu.dot_dimension_numbers<[1], [1], [0], [0], [0, 0, 1, 0], [], []>} : vector<8x64xf32>, vector<16x64xf32>, vector<8x16xf32> -> vector<8x16xf32>
    %c0_7 = arith.constant 0 : index
    %c0_8 = arith.constant 0 : index
    %19 = vector.load %arg6[%c0_7, %c0_8] : memref<8x16xf32, #tpu.memory_space<vmem>>, vector<8x16xf32>
    tpu.vector_store %arg6[%c0_7, %c0_8], %18 {strides = array<i32>} : memref<8x16xf32, #tpu.memory_space<vmem>>, vector<8x16xf32>,
    %c0_i32 = arith.constant 0 : i32
    %20 = arith.cmpi eq, %arg2, %c0_i32 : i32
    %21 = arith.extui %20 : i1 to i32
    %c0_i32_9 = arith.constant 0 : i32
    %22 = arith.cmpi ne, %21, %c0_i32_9 : i32
    scf.if %22 {
      %cst_30 = arith.constant 0.000000e+00 : f32
      %56 = vector.broadcast %cst_30 : f32 to vector<8x1xf32>
      %c0_31 = arith.constant 0 : index
      %c0_32 = arith.constant 0 : index
      %c0_33 = arith.constant 0 : index
      %57 = vector.load %arg7[%c0_31, %c0_32, %c0_33] : memref<1x8x1xf32, #tpu.memory_space<vmem>>, vector<1x8x1xf32>
      %58 = vector.shape_cast %57 : vector<1x8x1xf32> to vector<8x1xf32>
      %59 = vector.shape_cast %56 : vector<8x1xf32> to vector<1x8x1xf32>
      tpu.vector_store %arg7[%c0_31, %c0_32, %c0_33], %59 {strides = array<i32>} : memref<1x8x1xf32, #tpu.memory_space<vmem>>, vector<1x8x1xf32>,
      %cst_34 = arith.constant 0.000000e+00 : f32
      %60 = vector.broadcast %cst_34 : f32 to vector<8x1xf32>
      %c0_35 = arith.constant 0 : index
      %c0_36 = arith.constant 0 : index
      %c0_37 = arith.constant 0 : index
      %61 = vector.load %arg8[%c0_35, %c0_36, %c0_37] : memref<1x8x1xf32, #tpu.memory_space<vmem>>, vector<1x8x1xf32>
      %62 = vector.shape_cast %61 : vector<1x8x1xf32> to vector<8x1xf32>
      %63 = vector.shape_cast %60 : vector<8x1xf32> to vector<1x8x1xf32>
      tpu.vector_store %arg8[%c0_35, %c0_36, %c0_37], %63 {strides = array<i32>} : memref<1x8x1xf32, #tpu.memory_space<vmem>>, vector<1x8x1xf32>,
    } else {
    }
    %c1_i32 = arith.constant 1 : i32
    %23 = arith.muli %arg1, %c1_i32 : i32
    %24 = arith.addi %23, %arg2 : i32
    %c16_i32 = arith.constant 16 : i32
    %25 = arith.muli %24, %c16_i32 : i32
    %26 = tpu.iota {dimensions = array<i32: 1>} : vector<8x16xi32>
    %27 = vector.broadcast %25 : i32 to vector<8x16xi32>
    %28 = arith.addi %27, %26 : vector<8x16xi32>
    %c0_10 = arith.constant 0 : index
    %c0_11 = arith.constant 0 : index
    %29 = vector.load %arg5[%c0_10, %c0_11] : memref<8x1xi32, #tpu.memory_space<vmem>>, vector<8x1xi32>
    %30 = vector.broadcast %29 : vector<8x1xi32> to vector<8x16xi32>
    %31 = arith.cmpi eq, %28, %30 : vector<8x16xi32>
    %cst_12 = arith.constant dense<true> : vector<8x16xi1>
    %32 = arith.xori %31, %cst_12 : vector<8x16xi1>
    %c0_13 = arith.constant 0 : index
    %c0_14 = arith.constant 0 : index
    %c0_15 = arith.constant 0 : index
    %33 = vector.load %arg7[%c0_13, %c0_14, %c0_15] : memref<1x8x1xf32, #tpu.memory_space<vmem>>, vector<1x8x1xf32>
    %34 = vector.shape_cast %33 : vector<1x8x1xf32> to vector<8x1xf32>
    %cst_16 = arith.constant 0.980258166 : f32
    %35 = vector.broadcast %cst_16 : f32 to vector<8x16xf32>
    %36 = arith.mulf %35, %18 : vector<8x16xf32>
    %37 = math.exp %36 : vector<8x16xf32>
    %cst_17 = arith.constant 0.000000e+00 : f32
    %38 = vector.broadcast %cst_17 : f32 to vector<8x16xf32>
    %39 = arith.select %32, %37, %38 : vector<8x16xi1>, vector<8x16xf32>
    %cst_18 = arith.constant dense<0.000000e+00> : vector<8xf32>
    %40 = vector.multi_reduction <add>, %39, %cst_18 [1] : vector<8x16xf32> to vector<8xf32>
    %41 = vector.shape_cast %40 : vector<8xf32> to vector<8x1xf32>
    %42 = arith.addf %34, %41 : vector<8x1xf32>
    %c0_19 = arith.constant 0 : index
    %c0_20 = arith.constant 0 : index
    %c0_21 = arith.constant 0 : index
    %43 = vector.load %arg7[%c0_19, %c0_20, %c0_21] : memref<1x8x1xf32, #tpu.memory_space<vmem>>, vector<1x8x1xf32>
    %44 = vector.shape_cast %43 : vector<1x8x1xf32> to vector<8x1xf32>
    %45 = vector.shape_cast %42 : vector<8x1xf32> to vector<1x8x1xf32>
    tpu.vector_store %arg7[%c0_19, %c0_20, %c0_21], %45 {strides = array<i32>} : memref<1x8x1xf32, #tpu.memory_space<vmem>>, vector<1x8x1xf32>,
    %c0_22 = arith.constant 0 : index
    %c0_23 = arith.constant 0 : index
    %c0_24 = arith.constant 0 : index
    %46 = vector.load %arg8[%c0_22, %c0_23, %c0_24] : memref<1x8x1xf32, #tpu.memory_space<vmem>>, vector<1x8x1xf32>
    %47 = vector.shape_cast %46 : vector<1x8x1xf32> to vector<8x1xf32>
    %cst_25 = arith.constant 0.000000e+00 : f32
    %48 = vector.broadcast %cst_25 : f32 to vector<8x16xf32>
    %49 = arith.select %31, %18, %48 : vector<8x16xi1>, vector<8x16xf32>
    %cst_26 = arith.constant dense<0.000000e+00> : vector<8xf32>
    %50 = vector.multi_reduction <add>, %49, %cst_26 [1] : vector<8x16xf32> to vector<8xf32>
    %51 = vector.shape_cast %50 : vector<8xf32> to vector<8x1xf32>
    %52 = arith.addf %47, %51 : vector<8x1xf32>
    %c0_27 = arith.constant 0 : index
    %c0_28 = arith.constant 0 : index
    %c0_29 = arith.constant 0 : index
    %53 = vector.load %arg8[%c0_27, %c0_28, %c0_29] : memref<1x8x1xf32, #tpu.memory_space<vmem>>, vector<1x8x1xf32>
    %54 = vector.shape_cast %53 : vector<1x8x1xf32> to vector<8x1xf32>
    %55 = vector.shape_cast %52 : vector<8x1xf32> to vector<1x8x1xf32>
    tpu.vector_store %arg8[%c0_27, %c0_28, %c0_29], %55 {strides = array<i32>} : memref<1x8x1xf32, #tpu.memory_space<vmem>>, vector<1x8x1xf32>,
    return
  }
  func.func @transform_0(%arg0: i32, %arg1: i32, %arg2: i32) -> (i32, i32) {
    %c0_i32 = arith.constant 0 : i32
    %c0_i32_0 = arith.constant 0 : i32
    return %arg0, %c0_i32 : i32, i32
  }
  func.func @transform_1(%arg0: i32, %arg1: i32, %arg2: i32) -> (i32, i32) {
    %c1_i32 = arith.constant 1 : i32
    %0 = arith.muli %arg1, %c1_i32 : i32
    %1 = arith.addi %0, %arg2 : i32
    %c0_i32 = arith.constant 0 : i32
    %2 = arith.minsi %1, %c0_i32 : i32
    %c0_i32_0 = arith.constant 0 : i32
    %c0_i32_1 = arith.constant 0 : i32
    return %2, %c0_i32_0 : i32, i32
  }
  func.func @transform_2(%arg0: i32, %arg1: i32, %arg2: i32) -> (i32, i32) {
    %c0_i32 = arith.constant 0 : i32
    %c0_i32_0 = arith.constant 0 : i32
    return %arg0, %c0_i32 : i32, i32
  }
  func.func @transform_3(%arg0: i32, %arg1: i32, %arg2: i32) -> (i32, i32) {
    %c1_i32 = arith.constant 1 : i32
    %0 = arith.muli %arg1, %c1_i32 : i32
    %1 = arith.addi %0, %arg2 : i32
    %c0_i32 = arith.constant 0 : i32
    %2 = arith.minsi %1, %c0_i32 : i32
    %c0_i32_0 = arith.constant 0 : i32
    return %arg0, %2 : i32, i32
  }
  func.func @transform_4(%arg0: i32, %arg1: i32, %arg2: i32) -> (i32, i32, i32) {
    %c0_i32 = arith.constant 0 : i32
    %c0_i32_0 = arith.constant 0 : i32
    return %arg1, %arg0, %c0_i32 : i32, i32, i32
  }
  func.func @transform_5(%arg0: i32, %arg1: i32, %arg2: i32) -> (i32, i32, i32) {
    %c0_i32 = arith.constant 0 : i32
    %c0_i32_0 = arith.constant 0 : i32
    return %arg1, %arg0, %c0_i32 : i32, i32, i32
  }
}

</mosaic_0001>

<bundles_post_ra>
// kernel: tpu_custom_call.1
= control target key start
LH: loop header
LB: loop body
LE: loop exit
PB: predicated region body
PF: predicated region fallthrough
CT: control target
= control target key end

     0   :  { %11 = vsyncpa [#allocation3], 0  ;;  %s376_s0 = inlined_call_operand.vmem [shape: f32[8,64], index: 0, kind: input, shape index: {}]   ;;  %s377_s1 = inlined_call_operand.hbm [shape: f32[16,64], index: 1, kind: input, shape index: {}]   ;;  %s378_s2 = inlined_call_operand.vmem [shape: s32[8,1], index: 2, kind: input, shape index: {}]   ;;  %s379_s3 = inlined_call_operand.hbm [shape: f32[8,16], index: 3, kind: output, shape index: {0}]   ;;  %s380_s4 = inlined_call_operand.vmem [shape: f32[1,8,1], index: 4, kind: output, shape index: {1}]   ;;  %s381_s5 = inlined_call_operand.vmem [shape: f32[1,8,1], index: 5, kind: output, shape index: {2}]  }
   0x1   :  { %12 = vsyncpa [#allocation4], 0  ;;  %s295_s18 = smov [#allocation2]  }
   0x2   :  { %s26_s19 = sshll.u32 %s295_s18, 4  ;;  %s27_s19 = int_to_ptr.vmem [resolvable:$true] %s26_s19 }
   0x3   :  { %s259_s20 = scalar_lea.vmem %s27_s19, 256  ;;  %p264_p1 = scmp.lt.s32.totalorder %s27_s19, %s27_s19 }
   0x4   :  { %p260_p0 = scmp.ne.s32.totalorder %s27_s19, %s259_s20  ;;  %p265_p2 = scmp.lt.s32.totalorder %s259_s20, %s259_s20 }
   0x6   :  { %p266_p3 = por %p265_p2, %p264_p1 }
   0x8   :  { %p267_p4 = pnand %p266_p3, %p260_p0 }
   0xa   :  { %270 = shalt.err (!%p267_p4)
}
   0xb   :  { %s296_s21 = smov 128   ;;  %s297_s22 = smov 8  }
   0xc   :  { %32 = dma.hbm_to_vmem [thread:$0]  %s377_s1, 256, %s27_s19, [#allocation3], %s296_s21, %s296_s21, %s297_s22  }
   0xd   :  { %291 = dma.done.wait [#allocation3], 256  }
   0xe   :  { %292 = vsyncadd [#allocation3], 4294967040  ;;  %v47_v0 = vld [vmem:[#allocation2 + $0x8] sm:$0xff]  ;;  %vm49_vm0 = vcmask 523264   ;;  %v46_v1 = vld [vmem:[#allocation2] sm:$0xff]  ;;  %vm155_vm1 = vcmask 7168   ;;  %v160_v28 = vlaneseq }
   0xf   :  { %v45_v2 = vld [vmem:[%s376_s0] sm:$0xff]  ;;  %v56_v3 = vmul.f32 %v47_v0, %v47_v0  ;;  %v55_v4 = vmul.f32 %v46_v1, %v46_v1  ;;  %v298_v9 = vmov 0.0   ;;  %vm299_vm2 = vmmov 0  }
  0x10   :  { %v48_v5 = vmul.f32 %v45_v2, %v45_v2  ;;  %226 = vmatprep.subr.mxu0 %v298_v9  ;;  %156 = vst.msk [vmem:[%s380_s4] sm:$0xff] %vm155_vm1, %v298_v9  ;;  %157 = vst.msk [vmem:[%s381_s5] sm:$0xff] %vm155_vm1, %v298_v9  ;;  %230 = vmatprep.mubr.msk.f32.mxu0 %vm299_vm2, %v298_v9  ;;  %v164_v10 = vld [vmem:[%s378_s2] sm:$0xff]  ;;  %v300_v11 = vmov 0   ;;  %vm149_vm3 = vcmask 130048   ;;  %v161_v29 = vand.u32 127, %v160_v28 }
  0x11   :  { %v60_v6 = vsel %vm49_vm0, %v56_v3, 0.0  ;;  %v57_v8 = vsel %vm49_vm0, %v55_v4, 0.0  ;;  %241 = vset.pattern.permute.xlu1 %v300_v11  ;;  %242 = vset.pattern.permute.xlu0 %v300_v11  ;;  %vm301_vm5 = vmmov 1   ;;  %s302_s2 = smov [#allocation5]  }
  0x12   :  { %v50_v7 = vsel %vm49_vm0, %v48_v5, 0.0  ;;  %61 = vadd.xlane.f32.xlu0 %v60_v6  ;;  %s199_s6 = sshll.u32 %s302_s2, 4  ;;  %s200_s6 = int_to_ptr.vmem [resolvable:$true] %s199_s6 }
  0x13   :  { %51 = vadd.xlane.f32.xlu1 %v50_v7  ;;  %s271_s7 = scalar_lea.vmem %s200_s6, 128  ;;  %p276_p6 = scmp.lt.s32.totalorder %s200_s6, %s200_s6 }
  0x14   :  { %p272_p5 = scmp.ne.s32.totalorder %s200_s6, %s271_s7  ;;  %p277_p7 = scmp.lt.s32.totalorder %s271_s7, %s271_s7 }
  0x16   :  { %58 = vadd.xlane.f32.xlu0 %v57_v8  ;;  %p278_p8 = por %p277_p7, %p276_p6 }
  0x18   :  { %p279_p9 = pnand %p278_p8, %p272_p5 }
  0x24   :  { %166 = vperm.xlu1 %241, %v164_v10  }
  0x9b   :  { %v62_v12 = vpop.xlane.xlu0 %61 }
  0x9c   :  { %v52_v13 = vpop.xlane.xlu1 %51  ;;  %v64_v14 = vmax.f32 %v62_v12, 1e-24 }
  0x9d   :  { %v53_v15 = vmax.f32 %v52_v13, 1e-24 }
  0x9e   :  { %243 = vrsqrt.f32 %v64_v14 }
  0x9f   :  { %v59_v16 = vpop.xlane.xlu0 %58  ;;  %245 = vrsqrt.f32 %v53_v15 }
  0xa0   :  { %v63_v17 = vmax.f32 %v59_v16, 1e-24  ;;  %v167_v30 = vpop.permute.xlu1 %166 }
  0xa1   :  { %vm168_vm4 = vcmp.eq.s32.totalorder %v161_v29, %v167_v30 }
  0xa2   :  { %247 = vrsqrt.f32 %v63_v17  ;;  %vm169_vm6 = vmxor %vm168_vm4, %vm301_vm5 }
  0xab   :  { %v244_v18 = vpop.eup %243 }
  0xac   :  { %v69_v19 = vmul.f32 %v244_v18, %v47_v0  ;;  %v246_v20 = vpop.eup %245 }
  0xad   :  { %v67_v23 = vmul.f32 %v246_v20, %v45_v2 }
  0xae   :  { %227 = vmatpush3.xpose.msk.msra.mxu0 %vm49_vm0, %v69_v19 }
  0xaf   :  { %v248_v21 = vpop.eup %247  ;;  %228 = vmatprep.subr.mxu0 %v298_v9 }
  0xb0   :  { %v68_v22 = vmul.f32 %v248_v21, %v46_v1 }
  0xb2   :  { %229 = vmatpush3.xpose.msk.msra.mxu0 %vm49_vm0, %v68_v22 }
  0xb5   :  { %231 = vmatmul.mubr.msk.f32.vlgmr.msra.gmra.mxu0 %vm49_vm0, %v67_v23 }
 0x175   :  { %v145_v24 = vpop.f32.mrf.mxu0 }
 0x176   :  { %v171_v25 = vmul.f32 0.98025817, %v145_v24  ;;  %150 = vst.msk [vmem:[#allocation5] sm:$0xff] %vm149_vm3, %v145_v24  ;;  %v182_v34 = vsel %vm168_vm4, %v145_v24, 0.0 }
 0x177   :  { %v232_v26 = vpop.f32.mrf.mxu0  ;;  %v183_v35 = vsel %vm149_vm3, %v182_v34, 0.0 }
 0x178   :  { %v172_v27 = vmul.f32 1.442695, %v171_v25 }
 0x17a   :  { %249 = vpow2.f32 %v172_v27 }
 0x187   :  { %v250_v31 = vpop.eup %249 }
 0x188   :  { %v174_v32 = vsel %vm169_vm6, %v250_v31, 0.0 }
 0x189   :  { %v175_v33 = vsel %vm149_vm3, %v174_v32, 0.0 }
 0x18a   :  { %176 = vadd.xlane.f32.xlu0 %v175_v33 }
 0x18e   :  { %184 = vadd.xlane.f32.xlu0 %v183_v35 }
 0x18f   :  { %282 = shalt.err (!%p279_p9)
}
 0x190   :  { %202 = dma.vmem_to_hbm [thread:$0]  %s200_s6, 128, %s379_s3, [#allocation4]   ;;  %v170_v36 = vld [vmem:[%s380_s4] sm:$0xff] }
 0x191   :  { %v181_v39 = vld [vmem:[%s381_s5] sm:$0xff] }
 0x213   :  { %v177_v37 = vpop.xlane.xlu0 %176 }
 0x214   :  { %v178_v38 = vadd.f32 %v177_v37, %v170_v36 }
 0x216   :  { %180 = vst.msk [vmem:[%s380_s4] sm:$0xff] %vm155_vm1, %v178_v38 }
 0x217   :  { %v185_v40 = vpop.xlane.xlu0 %184 }
 0x218   :  { %v186_v41 = vadd.f32 %v185_v40, %v181_v39 }
 0x21a   :  { %187 = vst.msk [vmem:[%s381_s5] sm:$0xff] %vm155_vm1, %v186_v41 }
 0x21b   :  { %293 = dma.done.wait [#allocation4], 128  }
 0x21c   :  { %294 = vsyncadd [#allocation4], 4294967168 }
 0x21d   :  { %214 = vsyncpa [#allocation3], 1 }
 0x21e   :  { %215 = vsyncpa [#allocation4], 1 }

</bundles_post_ra>
